<compile_context>
chip_gen: v5e
topology: v5e:2x2
jax: 0.10.0
libtpu: 0.0.40
codegen_flags: <defaults>
</compile_context>

<pallas_src>
import jax
import jax.numpy as jnp
import numpy as np
from jax.experimental import pallas as pl
from jax.experimental.pallas import tpu as pltpu

BN_EPS = 1e-5


# --------------------------------------------------------------------------------------
# Kernels
# --------------------------------------------------------------------------------------

def _transition_matmul_kernel(w_ref, b_ref, x_ref, o_ref):
    """General path: one (batch, spatial-tile) block, out = relu(W_folded @ x + bias)."""
    x = x_ref[0]                                            # (C_in, s_tile) lane-dense
    y = jnp.dot(w_ref[...], x,                              # (C_out, C_in) @ (C_in, s_tile)
                preferred_element_type=jnp.float32)
    y = y + b_ref[...]                                      # (C_out, 1) broadcast over lanes
    o_ref[0] = jnp.maximum(y, 0.0).astype(o_ref.dtype)


def _transition_small_ch_kernel(w_ref, b_ref, x_ref, o_ref):
    """Small-channel path: channels never touch sublanes; contraction via VPU scalar MADs.

    w_ref: (C_out, C_in) SMEM, b_ref: (C_out,) SMEM,
    x_ref: (1, C_in, r_tile, 128) VMEM, o_ref: (1, C_out, r_tile, 128) VMEM.
    """
    c_in = x_ref.shape[1]
    c_out = o_ref.shape[1]
    for co in range(c_out):
        acc = x_ref[0, 0] * w_ref[co, 0] + b_ref[co]
        for ci in range(1, c_in):
            acc = acc + x_ref[0, ci] * w_ref[co, ci]
        o_ref[0, co] = jnp.maximum(acc, 0.0).astype(o_ref.dtype)


# --------------------------------------------------------------------------------------
# Host-side tiling helpers
# --------------------------------------------------------------------------------------

def _vmem_capacity_bytes():
    """Generation-aware VMEM capacity (v5e/v6e 128 MiB, v7x 64 MiB); conservative fallback."""
    try:
        info = pltpu.get_tpu_info()
        cap = getattr(info, "vmem_capacity_bytes", None)
        if cap:
            return int(cap)
    except Exception:
        pass
    return 64 * 1024 * 1024


def _pick_spatial_tile(hw, c_in, c_out, n_batch, budget):
    """Largest lane-dense (multiple-of-128) spatial tile that fits the VMEM budget."""
    if hw <= 128:
        return hw                                   # single block == full array dim
    per_lane = 2 * (c_in + c_out) * 4               # double-buffered in+out bytes per lane
    s_tile = min(8192, budget // per_lane)
    s_tile = max(128, (s_tile // 128) * 128)
    s_tile = min(s_tile, (hw // 128) * 128)         # never exceed array; last block masked
    # v7x megacore balance: keep >= 2 programs so both TensorCores get work.
    while n_batch * pl.cdiv(hw, s_tile) < 2 and s_tile > 128:
        s_tile = max(128, ((s_tile // 2) // 128) * 128)
    return s_tile


# --------------------------------------------------------------------------------------
# pallas_call wrappers
# --------------------------------------------------------------------------------------

def _run_matmul(x, w, b, n, c_in, c_out, hw, budget, vmem_cap, cost, out_dtype):
    s_tile = _pick_spatial_tile(hw, c_in, c_out, n, budget)
    grid = (n, pl.cdiv(hw, s_tile))
    working = 2 * (c_in + c_out) * s_tile * 4 + 4 * c_out * (c_in + 1) * 4
    vmem_limit = int(min(vmem_cap * 9 // 10, max(3 * working, 32 * 1024 * 1024)))
    return pl.pallas_call(
        _transition_matmul_kernel,
        out_shape=jax.ShapeDtypeStruct((n, c_out, hw), out_dtype),
        grid_spec=pltpu.PrefetchScalarGridSpec(
            num_scalar_prefetch=0,
            grid=grid,
            in_specs=[
                pl.BlockSpec((c_out, c_in), lambda i, s: (0, 0)),           # weight (resident)
                pl.BlockSpec((c_out, 1), lambda i, s: (0, 0)),              # bias   (resident)
                pl.BlockSpec((1, c_in, s_tile), lambda i, s: (i, 0, s)),    # x tile
            ],
            out_specs=pl.BlockSpec((1, c_out, s_tile), lambda i, s: (i, 0, s)),
        ),
        compiler_params=pltpu.CompilerParams(
            dimension_semantics=("parallel", "parallel"),
            vmem_limit_bytes=vmem_limit),
        cost_estimate=cost,
    )(w, b.reshape(c_out, 1), x)


def _run_small_channel(x, w, b, n, c_in, c_out, hw, budget, vmem_cap, cost, out_dtype):
    r = hw // 128                                     # multiple of 8 by construction
    x4 = x.reshape(n, c_in, r, 128)                   # free reshape, spatial on sublanes+lanes
    per_row = 2 * (c_in + c_out) * 128 * 4
    r_budget = max(8, budget // per_row)
    r_tile = 8
    for t in range(8, r + 1, 8):                      # largest multiple-of-8 divisor <= budget
        if r % t == 0 and t <= r_budget:
            r_tile = t
    if n == 1 and r_tile == r and r >= 16:            # v7x megacore: prefer >= 2 programs
        for t in range(r - 8, 7, -8):
            if r % t == 0:
                r_tile = t
                break
    grid = (n, r // r_tile)
    working = 2 * (c_in + c_out) * r_tile * 128 * 4
    vmem_limit = int(min(vmem_cap * 9 // 10, max(3 * working, 32 * 1024 * 1024)))
    return pl.pallas_call(
        _transition_small_ch_kernel,
        out_shape=jax.ShapeDtypeStruct((n, c_out, r, 128), out_dtype),
        grid_spec=pltpu.PrefetchScalarGridSpec(
            num_scalar_prefetch=0,
            grid=grid,
            in_specs=[
                pl.BlockSpec(memory_space=pltpu.MemorySpace.SMEM),          # folded weight
                pl.BlockSpec(memory_space=pltpu.MemorySpace.SMEM),          # folded bias
                pl.BlockSpec((1, c_in, r_tile, 128), lambda i, s: (i, 0, s, 0)),
            ],
            out_specs=pl.BlockSpec((1, c_out, r_tile, 128), lambda i, s: (i, 0, s, 0)),
        ),
        compiler_params=pltpu.CompilerParams(
            dimension_semantics=("parallel", "parallel"),
            vmem_limit_bytes=vmem_limit),
        cost_estimate=cost,
    )(w, b, x4)


def transition_conv(x_nchw, weight, gamma, beta, running_mean, running_var,
                    eps=BN_EPS, out_dtype=None):
    """PyTorch-compatible forward: x NCHW, weight (C_out, C_in, 1, 1), BN in eval form.

    out_dtype: pass jnp.bfloat16 if the downstream consumer accepts it (saves ~25-33% of
    HBM traffic on this mem-bound kernel); defaults to the input dtype for exact parity.
    """
    n, c_in, h, w_dim = x_nchw.shape
    c_out = weight.shape[0]
    hw = h * w_dim
    out_dtype = x_nchw.dtype if out_dtype is None else out_dtype

    # Fold BN (inference) into the 1x1 conv: y = (s*W) @ x + (beta - mean*s)
    scale = gamma.astype(jnp.float32) * jax.lax.rsqrt(running_var.astype(jnp.float32) + eps)
    w_folded = (weight.reshape(c_out, c_in).astype(jnp.float32) * scale[:, None])
    bias = (beta.astype(jnp.float32) - running_mean.astype(jnp.float32) * scale)

    x = x_nchw.reshape(n, c_in, hw).astype(jnp.float32)   # free reshape, no transpose

    vmem_cap = _vmem_capacity_bytes()
    budget = min(vmem_cap // 4, 32 * 1024 * 1024)         # per-step double-buffered working set

    cost = pl.CostEstimate(
        flops=2 * n * c_out * c_in * hw,
        transcendentals=0,
        bytes_accessed=4 * (n * hw * (c_in + c_out) + c_out * (c_in + 1)))

    # Small-channel path avoids C_in/C_out sublane padding; requires HW % 1024 == 0 so the
    # reshape to (R, 128) slabs is free and sublane-dense.
    use_small_ch = (c_in < 8) and (hw % 1024 == 0)

    if use_small_ch:
        out = _run_small_channel(x, w_folded, bias, n, c_in, c_out, hw,
                                 budget, vmem_cap, cost, out_dtype)
    else:
        out = _run_matmul(x, w_folded, bias, n, c_in, c_out, hw,
                          budget, vmem_cap, cost, out_dtype)
    return out.reshape(n, c_out, h, w_dim)


# --------------------------------------------------------------------------------------
# Reference + test
# --------------------------------------------------------------------------------------

def _reference(x, weight, gamma, beta, running_mean, running_var, eps=BN_EPS):
    y = jax.lax.conv_general_dilated(
        x, weight, window_strides=(1, 1), padding="VALID",
        dimension_numbers=("NCHW", "OIHW", "NCHW"))
    s = (gamma * jax.lax.rsqrt(running_var + eps))[None, :, None, None]
    y = (y - running_mean[None, :, None, None]) * s + beta[None, :, None, None]
    return jnp.maximum(y, 0.0)


if __name__ == "__main__":
    key = jax.random.PRNGKey(0)

    def make_case(k, n, c_in, c_out, h, w):
        kx, kw, kg, kb = jax.random.split(k, 4)
        x = jax.random.normal(kx, (n, c_in, h, w), jnp.float32)
        weight = jax.random.normal(kw, (c_out, c_in, 1, 1), jnp.float32) * 0.1
        gamma = 1.0 + 0.1 * jax.random.normal(kg, (c_out,), jnp.float32)
        beta = 0.1 * jax.random.normal(kb, (c_out,), jnp.float32)
        running_mean = 0.05 * jnp.arange(c_out, dtype=jnp.float32)
        running_var = 1.0 + 0.02 * jnp.arange(c_out, dtype=jnp.float32)
        return x, weight, gamma, beta, running_mean, running_var

    cases = [
        (2, 4, 8, 16, 16),   # shipped spec shape -> matmul path, exact lane tiles
        (1, 4, 8, 32, 32),   # small-channel VPU path (C_in < 8, HW % 1024 == 0)
        (1, 16, 8, 14, 14),  # non-multiple-of-128 spatial -> cdiv grid, masked last block
    ]
    keys = jax.random.split(key, len(cases))
    for k, (n, c_in, c_out, h, w) in zip(keys, cases):
        args = make_case(k, n, c_in, c_out, h, w)
        out = jax.block_until_ready(transition_conv(*args))
        ref = jax.block_until_ready(_reference(*args))
        assert out.shape == (n, c_out, h, w)
        np.testing.assert_allclose(np.asarray(out), np.asarray(ref), rtol=2e-3, atol=2e-3)

    print("KERNEL_OK")
</pallas_src>

<mosaic_0001>
module attributes {stable_mosaic.version = 11 : i64} {
  func.func @_transition_matmul_kernel(%arg0: i32, %arg1: i32, %arg2: memref<8x4xf32, #tpu.memory_space<vmem>>, %arg3: memref<8x1xf32, #tpu.memory_space<vmem>>, %arg4: memref<1x4x256xf32, #tpu.memory_space<vmem>>, %arg5: memref<1x8x256xf32, #tpu.memory_space<vmem>>) attributes {dimension_semantics = [#tpu.dimension_semantics<parallel>, #tpu.dimension_semantics<parallel>], iteration_bounds = array<i64: 2, 1>, scalar_prefetch = 0 : i64, scratch_operands = 0 : i64, tpu.core_type = #tpu.core_type<tc>, window_params = [{pipeline_mode = #tpu.pipeline_mode<synchronous>, transform_indices = @transform_0, window_bounds = array<i64: 8, 4>}, {pipeline_mode = #tpu.pipeline_mode<synchronous>, transform_indices = @transform_1, window_bounds = array<i64: 8, 1>}, {transform_indices = @transform_2, window_bounds = array<i64: 1, 4, 256>}, {transform_indices = @transform_3, window_bounds = array<i64: 1, 8, 256>}]} {
    %c0 = arith.constant 0 : index
    %c0_0 = arith.constant 0 : index
    %c0_1 = arith.constant 0 : index
    %0 = vector.load %arg4[%c0, %c0_0, %c0_1] : memref<1x4x256xf32, #tpu.memory_space<vmem>>, vector<1x4x256xf32>
    %1 = vector.shape_cast %0 : vector<1x4x256xf32> to vector<4x256xf32>
    %c0_2 = arith.constant 0 : index
    %c0_3 = arith.constant 0 : index
    %2 = vector.load %arg2[%c0_2, %c0_3] : memref<8x4xf32, #tpu.memory_space<vmem>>, vector<8x4xf32>
    %cst = arith.constant dense<0.000000e+00> : vector<8x256xf32>
    %3 = tpu.matmul %2, %1, %cst {dimension_numbers = #tpu.dot_dimension_numbers<[1], [0], [0], [1], [0, 0, 1, 1], [], []>} : vector<8x4xf32>, vector<4x256xf32>, vector<8x256xf32> -> vector<8x256xf32>
    %c0_4 = arith.constant 0 : index
    %c0_5 = arith.constant 0 : index
    %4 = vector.load %arg3[%c0_4, %c0_5] : memref<8x1xf32, #tpu.memory_space<vmem>>, vector<8x1xf32>
    %5 = vector.broadcast %4 : vector<8x1xf32> to vector<8x256xf32>
    %6 = arith.addf %3, %5 : vector<8x256xf32>
    %cst_6 = arith.constant 0.000000e+00 : f32
    %7 = vector.broadcast %cst_6 : f32 to vector<8x256xf32>
    %8 = arith.maximumf %6, %7 : vector<8x256xf32>
    %c0_7 = arith.constant 0 : index
    %c0_8 = arith.constant 0 : index
    %c0_9 = arith.constant 0 : index
    %9 = vector.load %arg5[%c0_7, %c0_8, %c0_9] : memref<1x8x256xf32, #tpu.memory_space<vmem>>, vector<1x8x256xf32>
    %10 = vector.shape_cast %9 : vector<1x8x256xf32> to vector<8x256xf32>
    %11 = vector.shape_cast %8 : vector<8x256xf32> to vector<1x8x256xf32>
    tpu.vector_store %arg5[%c0_7, %c0_8, %c0_9], %11 {strides = array<i32>} : memref<1x8x256xf32, #tpu.memory_space<vmem>>, vector<1x8x256xf32>,
    return
  }
  func.func @transform_0(%arg0: i32, %arg1: i32) -> (i32, i32) {
    %c0_i32 = arith.constant 0 : i32
    %c0_i32_0 = arith.constant 0 : i32
    %c0_i32_1 = arith.constant 0 : i32
    return %c0_i32, %c0_i32_0 : i32, i32
  }
  func.func @transform_1(%arg0: i32, %arg1: i32) -> (i32, i32) {
    %c0_i32 = arith.constant 0 : i32
    %c0_i32_0 = arith.constant 0 : i32
    %c0_i32_1 = arith.constant 0 : i32
    return %c0_i32, %c0_i32_0 : i32, i32
  }
  func.func @transform_2(%arg0: i32, %arg1: i32) -> (i32, i32, i32) {
    %c0_i32 = arith.constant 0 : i32
    %c0_i32_0 = arith.constant 0 : i32
    return %arg0, %c0_i32, %arg1 : i32, i32, i32
  }
  func.func @transform_3(%arg0: i32, %arg1: i32) -> (i32, i32, i32) {
    %c0_i32 = arith.constant 0 : i32
    %c0_i32_0 = arith.constant 0 : i32
    return %arg0, %c0_i32, %arg1 : i32, i32, i32
  }
}

</mosaic_0001>

<bundles_post_ra>
// kernel: tpu_custom_call.1
= control target key start
LH: loop header
LB: loop body
LE: loop exit
PB: predicated region body
PF: predicated region fallthrough
CT: control target
= control target key end

     0   :  { %8 = vsyncpa [#allocation3], 0  ;;  %s640_s0 = inlined_call_operand.vmem [shape: f32[8,4], index: 0, kind: input, shape index: {}]   ;;  %s641_s1 = inlined_call_operand.vmem [shape: f32[8,1], index: 1, kind: input, shape index: {}]   ;;  %s642_s2 = inlined_call_operand.vmem [shape: f32[2,4,256], index: 2, kind: input, shape index: {}]   ;;  %s643_s3 = inlined_call_operand.hbm [shape: f32[2,8,256], index: 3, kind: output, shape index: {}]  }
   0x1   :  { %10 = vsyncpa [#allocation3 + $0x1], 0  ;;  %s537_s12 = smov 0   ;;  %s539_s13 = smov 0  }
   0x2   :  { %s541_s14 = smov 0   ;;  %s543_s15 = smov 0  }
   0x3   :  { %s545_s16 = smov 0   ;;  %s547_s17 = smov 0  }
   0x4 LB: > { %s360_s18 = sadd.s32 4294967295, %s514_s17   ;;  %s361_s19 = sadd.s32 4294967294, %s514_s17   ;;  %s514_s17 = sphi %s547_s17, %s16_s17   ;;  %s510_s16 = sphi %s545_s16, %s650_s16   ;;  %s506_s15 = sphi %s543_s15, %s649_s15   ;;  %s502_s14 = sphi %s541_s14, %s648_s14   ;;  %s498_s13 = sphi %s539_s13, %s647_s13   ;;  %s494_s12 = sphi %s537_s12, %s646_s12  }
   0x5   : > { %s28_s20 = sadd.s32 1, %s510_s16  ;;  %s107_s21 = sadd.s32 1, %s502_s14 }
   0x6   : > { %p30_p0 = scmp.ge.s32.totalorder %s28_s20, 2  ;;  %p117_p1 = scmp.ne.s32.totalorder %s502_s14, %s498_s13 }
   0x7   : > { %p118_p2 = scmp.eq.s32.totalorder %s360_s18, 1  ;;  %p123_p3 = scmp.ne.s32.totalorder %s498_s13, %s494_s12 }
   0x8   : > { %s652_s20 = smov (%p30_p0, %s28_s20), 0  ;;  %p124_p5 = scmp.eq.s32.totalorder %s361_s19, 1 }
   0x9   : > { %p577_p4 = por %p118_p2, %p117_p1  ;;  %s102_s23 = ssub.s32 %s510_s16, %s652_s20 }
   0xa   : > { %p364_p6 = scmp.ge.s32.totalorder %s514_s17, 1  ;;  %p105_p7 = scmp.eq.s32.totalorder %s102_s23, 0 }
   0xb   : > { %p584_p8 = por %p124_p5, %p123_p3  ;;  %p161_p9 = scmp.lt.s32.totalorder %s514_s17, 3 }
   0xc   : > { %s590_s25 = scalar_select %p105_p7, %s502_s14, %s107_s21  }
   0xd   : > { %p162_p10 = pnand %p364_p6, %p161_p9 }
   0xe   : > { %p190_p11 = scmp.lt.s32.totalorder (!%p162_p10), %s506_s15, 1  ;;  %s186_s8 = sand.u32 (!%p162_p10), 1, %s498_s13  }
   0xf   : > { %165 = sbr.rel (%p162_p10) target bundleno = 168 (0xa8), region = 32  ;;  %s365_s9 = sshll.u32 (!%p162_p10), %s186_s8, 4 }
  0x10   : > { %s378_s10 = sshll.u32 (!%p162_p10), %s506_s15, 4  ;;  %s188_s21 = scalar_lea.vmem (!%p162_p10), [#allocation2], %s365_s9 }
  0x11   : > { %s279_s19 = scalar_lea.hbm (!%p162_p10), %s643_s3, %s378_s10  ;;  %s281_s23 = sshll.u32 (!%p162_p10), %s188_s21, 4  ;;  %s282_s23 = int_to_ptr.vmem [resolvable:$true] %s281_s23 }
  0x12   : > { %s283_s26 = sshll.u32 (!%p162_p10), %s279_s19, 4  ;;  %s456_s4 = scalar_lea.hbm (!%p162_p10), %s643_s3, 32  ;;  %s284_s26 = int_to_ptr.hbm [resolvable:$true] %s283_s26 }
  0x13   : > { %s450_s27 = sshra.s32 (!%p162_p10), %s284_s26, 4  ;;  %s451_s27 = int_to_ptr.hbm [resolvable:$true] %s450_s27 }
  0x14   : > { %v202_v0 = vld [vmem:[%s641_s1] sm:$0xff]  ;;  %v516_v1 = vmov 0   ;;  %s191_s28 = scalar_select %p190_p11, %s506_s15, 1  ;;  %vm216_vm0 = vcmask 1043456   ;;  %vm212_vm1 = vcmask 31744  }
  0x15   : > { %435 = vset.pattern.permute.xlu0 %v516_v1  ;;  %v201_v3 = vld [vmem:[%s640_s0] sm:$0xff]  ;;  %s266_s15 = scalar_lea.sflag [#allocation3], %s186_s8  ;;  %p457_p1 = scmp.lt.s32.totalorder %s451_s27, %s643_s3 }
  0x16   : > { %205 = vperm.xlu0 %435, %v202_v0   ;;  %s377_s29 = sshll.u32 %s191_s28, 3  ;;  %s452_s28 = scalar_lea.hbm %s451_s27, 16 }
  0x17   : > { %s197_s5 = scalar_lea.vmem %s642_s2, %s377_s29  ;;  %p453_p12 = scmp.ne.s32.totalorder %s451_s27, %s452_s28 }
  0x18   : > { %v200_v2 = vld [vmem:[%s197_s5] sm:$0xff]  ;;  %p458_p2 = scmp.lt.s32.totalorder %s456_s4, %s452_s28 }
  0x19   : > { %209 = vst [vmem:[#allocation1] ss:$2 sm:$0xff] %v200_v2  ;;  %p454_p13 = pnand %p453_p12, %p577_p4 }
  0x1a   : > { %p459_p3 = por %p458_p2, %p457_p1 }
  0x1b   : > { %p455_p0 = pneg %p454_p13 }
  0x1d   : > { %p460_p5 = pnand %p459_p3, %p455_p0 }
  0x20   : > { %v210_v4 = vld.sshfl [vmem:[#allocation1] sm:$0xff pattern:$0x75316420]  ;;  %v211_v5 = vld.sshfl [vmem:[#allocation1 + $0x8] sm:$0xff pattern:$0x75316420] }
  0x21   : > { %368 = vmatpush.msk.msra.mxu0 %vm216_vm0, %v210_v4  ;;  %370 = vmatpush.msk.msra.mxu1 %vm216_vm0, %v211_v5 }
  0x22   : > { %369 = vmatmul.msk.f32.vlgmr.msra.gmra.mxu0 %vm212_vm1, %v201_v3  ;;  %371 = vmatmul.msk.f32.vlgmr.msra.gmra.mxu1 %vm212_vm1, %v201_v3 }
  0x88   : > { %v206_v6 = vpop.permute.xlu0 %205 }
  0x9f   : > { %v238_v7 = vpop.f32.mrf.mxu0  ;;  %v258_v8 = vpop.f32.mrf.mxu1 }
  0xa0   : > { %v239_v9 = vadd.f32 %v238_v7, %v206_v6  ;;  %v259_v10 = vadd.f32 %v258_v8, %v206_v6 }
  0xa2   : > { %v261_v11 = vmax.f32 %v239_v9, 0.0  ;;  %v262_v12 = vmax.f32 %v259_v10, 0.0 }
  0xa4   : > { %263 = vst [vmem:[%s188_s21] sm:$0xff] %v261_v11 }
  0xa5   : > { %264 = vst [vmem:[%s188_s21 + $0x8] sm:$0xff] %v262_v12 }
  0xa6   : > { %463 = shalt.err (!%p460_p5)
}
  0xa7   : > { %379 = dma.vmem_to_hbm [thread:$0]  (%p577_p4), %s282_s23, 256, %s284_s26, %s266_s15  }
  0xa8 PF: > { %p385_p6 = scmp.ge.s32.totalorder %s514_s17, 2  ;;  %s295_s7 = sand.u32 1, %s494_s12  }
  0xa9   : > { %s296_s8 = scalar_lea.sflag [#allocation3], %s295_s7 }
  0xaa   : > { %p382_p7 = pnand %p385_p6, %p584_p8 }
  0xac   : > { %p383_p9 = pneg %p382_p7 }
  0xae   : > { %489 = dma.done.wait (%p383_p9), %s296_s8, 256  }
  0xaf   : > { %491 = vsyncadd (%p383_p9), %s296_s8, 4294967040  ;;  %s16_s17 = sadd.s32 1, %s514_s17   ;;  %s646_s12 = smov %s498_s13 }
  0xb0   : > { %p13_p10 = scmp.ge.s32.totalorder %s16_s17, 4   ;;  %s647_s13 = smov %s502_s14 }
  0xb1   : > { %s648_s14 = smov %s590_s25  ;;  %s649_s15 = smov %s510_s16 }
  0xb2   : > { %s650_s16 = smov %s652_s20  ;;  %15 = sbr.rel (!%p13_p10) target bundleno = 4 (0x4), region = 67 }
  0xb7   :  { %302 = vsyncpa [#allocation3], 1 }
  0xb8   :  { %304 = vsyncpa [#allocation3 + $0x1], 1 }

</bundles_post_ra>
